<compile_context>
chip_gen: v7x
topology: tpu7x:2x2x1
jax: 0.10.0
libtpu: 0.0.40
codegen_flags: <defaults>
</compile_context>

<pallas_src>
import jax
import jax.numpy as jnp
from jax.experimental import pallas as pl
from jax.experimental.pallas import tpu as pltpu

PACK = 8  # logical rows packed per 128-lane VMEM row (8 * 16 = 128)


def _linear_kernel(x_ref, w_ref, b_ref, o_ref):
    # x_ref: (TB, Kp) ; w_ref: (Kp, Np), already MXU-oriented ; b_ref: (1, Np)
    acc = jnp.dot(x_ref[...], w_ref[...], preferred_element_type=jnp.float32)
    o_ref[...] = (acc + b_ref[...]).astype(o_ref.dtype)


def prepare_linear_params(weight, bias, pack=PACK):
    """One-time parameter prep from PyTorch nn.Linear layout.

    weight: (N, K) = (out_features, in_features); bias: (N,)
    Returns the plain (K, N) weight plus an `pack`-way block-diagonal
    (pack*K, pack*N) weight used by the lane-packed fast path.
    """
    N, K = weight.shape
    w_kn = weight.T                                                 # (K, N)
    w_packed = jnp.kron(jnp.eye(pack, dtype=weight.dtype), w_kn)    # (pack*K, pack*N)
    return {
        "K": K, "N": N, "pack": pack,
        "w_kn": w_kn, "b": bias[None, :],
        "w_packed": w_packed, "b_packed": jnp.tile(bias, pack)[None, :],
    }


def linear_pallas(x, params, *, batch_tile=4096):
    """y = x @ weight.T + bias  (PyTorch nn.Linear(16, 32) semantics)."""
    B, K = x.shape
    N, pack = params["N"], params["pack"]
    assert K == params["K"]

    if B % pack == 0:
        # Lane-dense fast path: 8 logical rows per 128-lane row, block-diag W.
        xp = x.reshape(B // pack, pack * K)          # free row-major reshape
        w, b = params["w_packed"], params["b_packed"]
        rows, row_tile = B // pack, batch_tile // pack
    else:
        # Fallback for ragged batches (keeps the logical layout).
        xp, w, b = x, params["w_kn"], params["b"]
        rows, row_tile = B, batch_tile

    cols_in, cols_out = w.shape
    cost = pl.CostEstimate(
        flops=2 * rows * cols_in * cols_out,
        transcendentals=0,
        bytes_accessed=4 * (rows * cols_in + cols_in * cols_out
                            + cols_out + rows * cols_out),
    )
    out_shape = jax.ShapeDtypeStruct((rows, cols_out), x.dtype)

    if rows <= row_tile:
        # Grid-free: single invocation, everything resident in VMEM.
        yp = pl.pallas_call(
            _linear_kernel,
            out_shape=out_shape,
            in_specs=[pl.BlockSpec(memory_space=pltpu.MemorySpace.VMEM)] * 3,
            out_specs=pl.BlockSpec(memory_space=pltpu.MemorySpace.VMEM),
            cost_estimate=cost,
        )(xp, w, b)
        return yp.reshape(B, N)

    # Batch-tiled path: weight/bias map to the same whole-array block every
    # step, so they are DMA'd once and stay resident across the grid.
    assert row_tile % 8 == 0, "batch_tile must keep the sublane dim 8-aligned"
    grid = (pl.cdiv(rows, row_tile),)

    def call(semantics):
        return pl.pallas_call(
            _linear_kernel,
            out_shape=out_shape,
            grid=grid,
            in_specs=[
                pl.BlockSpec((row_tile, cols_in), lambda i: (i, 0)),
                pl.BlockSpec((cols_in, cols_out), lambda i: (0, 0)),
                pl.BlockSpec((1, cols_out), lambda i: (0, 0)),
            ],
            out_specs=pl.BlockSpec((row_tile, cols_out), lambda i: (i, 0)),
            compiler_params=pltpu.CompilerParams(
                dimension_semantics=(semantics,)),
            cost_estimate=cost,
        )(xp, w, b)

    try:
        # v7x: shard batch tiles across both TensorCores.
        yp = call(pltpu.CORE_PARALLEL)
    except Exception:
        # Single-TC chips (v5e/v6e) or lowerings without core_parallel support.
        yp = call(pltpu.PARALLEL)
    return yp.reshape(B, N)


if __name__ == "__main__":
    key = jax.random.PRNGKey(0)
    kx, kw, kb, kx2 = jax.random.split(key, 4)

    IN, OUT = 16, 32
    bound = 1.0 / (IN ** 0.5)  # mimic PyTorch default uniform init bound
    weight = jax.random.uniform(kw, (OUT, IN), jnp.float32, -bound, bound)  # (out, in)
    bias = jax.random.uniform(kb, (OUT,), jnp.float32, -bound, bound)

    # One-time parameter prep (transpose + block-diag expansion), outside the hot path.
    params = prepare_linear_params(weight, bias)

    # --- Small batch (module-consistent shape): grid-free lane-packed kernel. ---
    B = 8
    x = jax.random.normal(kx, (B, IN), jnp.float32)
    y = linear_pallas(x, params)
    jax.block_until_ready(y)
    y_ref = x @ weight.T + bias
    assert y.shape == (B, OUT)
    assert jnp.allclose(y, y_ref, atol=1e-5, rtol=1e-5)

    # --- Large batch: batch-tiled grid path (grid=4 => both v7x TCs get >=2 steps). ---
    B2 = 16384
    x2 = jax.random.normal(kx2, (B2, IN), jnp.float32)
    y2 = linear_pallas(x2, params, batch_tile=4096)
    jax.block_until_ready(y2)
    y2_ref = x2 @ weight.T + bias
    assert y2.shape == (B2, OUT)
    assert jnp.allclose(y2, y2_ref, atol=1e-4, rtol=1e-5)

    # --- Ragged batch (not a multiple of 8): exercises the unpacked fallback. ---
    B3 = 5
    x3 = jax.random.normal(kx, (B3, IN), jnp.float32)
    y3 = linear_pallas(x3, params)
    jax.block_until_ready(y3)
    assert jnp.allclose(y3, x3 @ weight.T + bias, atol=1e-5, rtol=1e-5)

    print("KERNEL_OK")
</pallas_src>

<mosaic_0001>
module attributes {stable_mosaic.version = 11 : i64} {
  func.func @_linear_kernel(%arg0: memref<1x128xf32, #tpu.memory_space<vmem>>, %arg1: memref<128x256xf32, #tpu.memory_space<vmem>>, %arg2: memref<1x256xf32, #tpu.memory_space<vmem>>, %arg3: memref<1x256xf32, #tpu.memory_space<vmem>>) attributes {dimension_semantics = [], scalar_prefetch = 0 : i64, scratch_operands = 0 : i64, tpu.core_type = #tpu.core_type<tc>} {
    %c0 = arith.constant 0 : index
    %c0_0 = arith.constant 0 : index
    %0 = vector.load %arg0[%c0, %c0_0] : memref<1x128xf32, #tpu.memory_space<vmem>>, vector<1x128xf32>
    %c0_1 = arith.constant 0 : index
    %c0_2 = arith.constant 0 : index
    %1 = vector.load %arg1[%c0_1, %c0_2] : memref<128x256xf32, #tpu.memory_space<vmem>>, vector<128x256xf32>
    %cst = arith.constant dense<0.000000e+00> : vector<1x256xf32>
    %2 = tpu.matmul %0, %1, %cst {dimension_numbers = #tpu.dot_dimension_numbers<[1], [0], [0], [1], [0, 0, 1, 1], [], []>} : vector<1x128xf32>, vector<128x256xf32>, vector<1x256xf32> -> vector<1x256xf32>
    %c0_3 = arith.constant 0 : index
    %c0_4 = arith.constant 0 : index
    %3 = vector.load %arg2[%c0_3, %c0_4] : memref<1x256xf32, #tpu.memory_space<vmem>>, vector<1x256xf32>
    %4 = arith.addf %2, %3 : vector<1x256xf32>
    %c0_5 = arith.constant 0 : index
    %c0_6 = arith.constant 0 : index
    %5 = vector.load %arg3[%c0_5, %c0_6] : memref<1x256xf32, #tpu.memory_space<vmem>>, vector<1x256xf32>
    tpu.vector_store %arg3[%c0_5, %c0_6], %4 {strides = array<i32>} : memref<1x256xf32, #tpu.memory_space<vmem>>, vector<1x256xf32>,
    return
  }
}

</mosaic_0001>

<bundles_post_ra>
// kernel: tpu_custom_call.1
= control target key start
LH: loop header
LB: loop body
LE: loop exit
PB: predicated region body
PF: predicated region fallthrough
CT: control target
= control target key end

     0   :  { %8 = vsyncpa [#allocation3], 0  ;;  %s380_s0 = inlined_call_operand.hbm [shape: f32[1,128], index: 0, kind: input, shape index: {}]   ;;  %s381_s1 = inlined_call_operand.hbm [shape: f32[128,256], index: 1, kind: input, shape index: {}]   ;;  %s382_s2 = inlined_call_operand.vmem [shape: f32[1,256], index: 2, kind: input, shape index: {}]   ;;  %s383_s3 = inlined_call_operand.hbm [shape: f32[1,256], index: 3, kind: output, shape index: {}]  }
   0x1   :  { %9 = vsyncpa [#allocation6], 0 }
   0x2   :  { %10 = vsyncpa [#allocation4], 0  ;;  %s307_s12 = smov [#allocation2]   ;;  %s308_s14 = smov [#allocation5]  }
   0x3   :  { %s17_s13 = sshll.u32 %s307_s12, 4  ;;  %s26_s15 = sshll.u32 %s308_s14, 4  ;;  %s18_s13 = int_to_ptr.vmem [resolvable:$true] %s17_s13  ;;  %s334_s15 = int_to_ptr.vmem [resolvable:$true] %s26_s15 }
   0x4   :  { %s235_s18 = scalar_lea.hbm %s380_s0, 16 }
   0x5   :  { %p236_p0 = scmp.ne.s32.totalorder %s380_s0, %s235_s18  ;;  %p239_p1 = scmp.lt.u32.totalorder %s235_s18, %s380_s0 }
   0x7   :  { %p241_p2 = pnand %p239_p1, %p236_p0 }
   0x9   :  { %244 = shalt.err (!%p241_p2)
}
   0xa   :  { %s245_s23 = scalar_lea.vmem %s18_s13, 16  ;;  %s249_s24 = scalar_lea.vmem %s18_s13, 32 }
   0xb   :  { %p246_p3 = scmp.ne.s32.totalorder %s18_s13, %s245_s23  ;;  %p250_p4 = scmp.lt.s32.totalorder %s18_s13, %s18_s13 }
   0xc   :  { %p251_p5 = scmp.lt.s32.totalorder %s249_s24, %s245_s23 }
   0xe   :  { %p252_p6 = por %p251_p5, %p250_p4 }
  0x10   :  { %p253_p7 = pnand %p252_p6, %p246_p3 }
  0x12   :  { %256 = shalt.err (!%p253_p7)
}
  0x13   :  { %20 = dma.hbm_to_vmem [thread:$0]  %s380_s0, 16, %s18_s13, [#allocation3]  }
  0x14   :  { %s257_s29 = scalar_lea.hbm %s381_s1, 4096 }
  0x15   :  { %p258_p8 = scmp.ne.s32.totalorder %s381_s1, %s257_s29  ;;  %p261_p9 = scmp.lt.u32.totalorder %s257_s29, %s381_s1 }
  0x17   :  { %p263_p10 = pnand %p261_p9, %p258_p8 }
  0x19   :  { %266 = shalt.err (!%p263_p10)
}
  0x1a   :  { %s267_s7 = scalar_lea.vmem %s334_s15, 4096  ;;  %p272_p12 = scmp.lt.s32.totalorder %s334_s15, %s334_s15 }
  0x1b   :  { %p268_p11 = scmp.ne.s32.totalorder %s334_s15, %s267_s7  ;;  %p273_p13 = scmp.lt.s32.totalorder %s267_s7, %s267_s7 }
  0x1d   :  { %p274_p0 = por %p273_p13, %p272_p12 }
  0x1f   :  { %p275_p1 = pnand %p274_p0, %p268_p11 }
  0x21   :  { %278 = shalt.err (!%p275_p1)
}
  0x22   :  { %s309_s0 = smov 256   ;;  %s310_s8 = smov 16  }
  0x23   :  { %32 = dma.hbm_to_vmem [thread:$0]  %s381_s1, 4096, %s334_s15, [#allocation6], %s309_s0, %s309_s0, %s310_s8  }
  0x24   :  { %301 = dma.done.wait [#allocation3], 16  }
  0x25   :  { %302 = vsyncadd [#allocation3], 4294967280 }
  0x26   :  { %303 = dma.done.wait [#allocation6], 4096  }
  0x27   :  { %304 = vsyncadd [#allocation6], 4294963200  ;;  %v311_v0 = vmov 0.0   ;;  %v43_v1 = vld [vmem:[#allocation5 + $0x8] sm:$0xff]  ;;  %v45_v2 = vld [vmem:[#allocation5 + $0x18] sm:$0xff]  ;;  %v76_v50 = vlaneseq  ;;  %s313_s12 = smov [#allocation7]  }
  0x28   :  { %150 = vmatprep.mubr.f32.mxu0 %v311_v0  ;;  %v42_v3 = vld [vmem:[#allocation5] sm:$0xff]  ;;  %v196_v4 = vpack.c.bf16 %v45_v2, %v43_v1  ;;  %v44_v5 = vld [vmem:[#allocation5 + $0x10] sm:$0xff]  ;;  %v47_v6 = vld [vmem:[#allocation5 + $0x28] sm:$0xff]  ;;  %v312_v55 = vmov 1966171168   ;;  %s186_s13 = sshll.u32 %s313_s12, 4  ;;  %s187_s13 = int_to_ptr.vmem [resolvable:$true] %s186_s13 }
  0x29   :  { %v49_v7 = vld [vmem:[#allocation5 + $0x38] sm:$0xff]  ;;  %v198_v8 = vpack.c.bf16 %v44_v5, %v42_v3  ;;  %v46_v10 = vld [vmem:[#allocation5 + $0x20] sm:$0xff]  ;;  %v48_v11 = vld [vmem:[#allocation5 + $0x30] sm:$0xff]  ;;  %v77_v51 = vshrl.u32 %v76_v50, 7  ;;  %v161_v56 = vunpack.c.l.s4 %v312_v55  ;;  %vm177_vm0 = vcmp.lt.s32.totalorder %v76_v50, 256  ;;  %p284_p3 = scmp.lt.s32.totalorder %s187_s13, %s187_s13 }
  0x2a   :  { %v200_v9 = vpack.c.bf16 %v49_v7, %v47_v6  ;;  %v51_v12 = vld [vmem:[#allocation5 + $0x48] sm:$0xff]  ;;  %197 = vmatprep.subr.bf16.mxu0 %v196_v4  ;;  %v53_v13 = vld [vmem:[#allocation5 + $0x58] sm:$0xff]  ;;  %v202_v14 = vpack.c.bf16 %v48_v11, %v46_v10  ;;  %v50_v16 = vld [vmem:[#allocation5 + $0x40] sm:$0xff] }
  0x2b   :  { %199 = vmatpush1.bf16.msra.mxu0 %v198_v8  ;;  %v204_v15 = vpack.c.bf16 %v53_v13, %v51_v12  ;;  %v52_v17 = vld [vmem:[#allocation5 + $0x50] sm:$0xff]  ;;  %v55_v18 = vld [vmem:[#allocation5 + $0x68] sm:$0xff]  ;;  %v57_v19 = vld [vmem:[#allocation5 + $0x78] sm:$0xff]  ;;  %v78_v52 = vsub.s32 0, %v77_v51  ;;  %v82_v54 = vsub.s32 1, %v77_v51  ;;  %v162_v59 = vunpack.c.0.s8 %v161_v56 }
  0x2c   :  { %201 = vmatprep.subr.bf16.mxu0 %v200_v9  ;;  %v206_v20 = vpack.c.bf16 %v52_v17, %v50_v16  ;;  %v208_v21 = vpack.c.bf16 %v57_v19, %v55_v18  ;;  %v54_v22 = vld [vmem:[#allocation5 + $0x60] sm:$0xff]  ;;  %v56_v23 = vld [vmem:[#allocation5 + $0x70] sm:$0xff]  ;;  %v59_v24 = vld [vmem:[#allocation5 + $0x88] sm:$0xff] }
  0x2d   :  { %v61_v25 = vld [vmem:[#allocation5 + $0x98] sm:$0xff]  ;;  %v210_v26 = vpack.c.bf16 %v56_v23, %v54_v22  ;;  %v58_v28 = vld [vmem:[#allocation5 + $0x80] sm:$0xff]  ;;  %v60_v29 = vld [vmem:[#allocation5 + $0x90] sm:$0xff]  ;;  %v165_v0 = vsub.s32 %v162_v59, %v77_v51 }
  0x2e   :  { %v212_v27 = vpack.c.bf16 %v61_v25, %v59_v24  ;;  %v63_v30 = vld [vmem:[#allocation5 + $0xa8] sm:$0xff]  ;;  %v65_v31 = vld [vmem:[#allocation5 + $0xb8] sm:$0xff]  ;;  %v214_v32 = vpack.c.bf16 %v60_v29, %v58_v28  ;;  %v62_v34 = vld [vmem:[#allocation5 + $0xa0] sm:$0xff] }
  0x2f   :  { %203 = vmatpush1.bf16.msra.mxu0 %v202_v14  ;;  %v216_v33 = vpack.c.bf16 %v65_v31, %v63_v30  ;;  %v64_v35 = vld [vmem:[#allocation5 + $0xb0] sm:$0xff]  ;;  %v67_v36 = vld [vmem:[#allocation5 + $0xc8] sm:$0xff]  ;;  %v69_v37 = vld [vmem:[#allocation5 + $0xd8] sm:$0xff] }
  0x30   :  { %205 = vmatprep.subr.bf16.mxu0 %v204_v15  ;;  %v218_v38 = vpack.c.bf16 %v64_v35, %v62_v34  ;;  %v220_v39 = vpack.c.bf16 %v69_v37, %v67_v36  ;;  %v66_v40 = vld [vmem:[#allocation5 + $0xc0] sm:$0xff]  ;;  %v68_v41 = vld [vmem:[#allocation5 + $0xd0] sm:$0xff]  ;;  %v71_v42 = vld [vmem:[#allocation5 + $0xe8] sm:$0xff] }
  0x31   :  { %v73_v43 = vld [vmem:[#allocation5 + $0xf8] sm:$0xff]  ;;  %v222_v44 = vpack.c.bf16 %v68_v41, %v66_v40  ;;  %v70_v46 = vld [vmem:[#allocation5 + $0xe0] sm:$0xff]  ;;  %v72_v47 = vld [vmem:[#allocation5 + $0xf0] sm:$0xff] }
  0x32   :  { %v224_v45 = vpack.c.bf16 %v73_v43, %v71_v42  ;;  %v226_v48 = vpack.c.bf16 %v72_v47, %v70_v46  ;;  %v41_v49 = vld [vmem:[#allocation2] sm:$0x1]  ;;  %v74_v53 = vld [vmem:[%s382_s2] sm:$0x3]  ;;  %s279_s2 = scalar_lea.vmem %s187_s13, 32 }
  0x33   :  { %207 = vmatpush1.bf16.msra.mxu0 %v206_v20  ;;  %v79_v57 = vrot.slane %v74_v53, %v78_v52  ;;  %v83_v58 = vrot.slane %v74_v53, %v82_v54  ;;  %p280_p2 = scmp.ne.s32.totalorder %s187_s13, %s279_s2  ;;  %p285_p4 = scmp.lt.s32.totalorder %s279_s2, %s279_s2 }
  0x34   :  { %209 = vmatprep.subr.bf16.mxu0 %v208_v21 }
  0x35   :  { %p286_p5 = por %p285_p4, %p284_p3 }
  0x37   :  { %211 = vmatpush1.bf16.msra.mxu0 %v210_v26  ;;  %p287_p6 = pnand %p286_p5, %p280_p2 }
  0x38   :  { %213 = vmatprep.subr.bf16.mxu0 %v212_v27 }
  0x3b   :  { %215 = vmatpush1.bf16.msra.mxu0 %v214_v32 }
  0x3c   :  { %217 = vmatprep.subr.bf16.mxu0 %v216_v33 }
  0x3f   :  { %219 = vmatpush1.bf16.msra.mxu0 %v218_v38 }
  0x40   :  { %221 = vmatprep.subr.bf16.mxu0 %v220_v39 }
  0x43   :  { %223 = vmatpush1.bf16.msra.mxu0 %v222_v44 }
  0x44   :  { %225 = vmatprep.subr.bf16.mxu0 %v224_v45 }
  0x47   :  { %227 = vmatpush1.bf16.msra.mxu0 %v226_v48 }
  0x4a   :  { %151 = vmatmul.mubr.f32.vlgmr.msra.gmra.mrb[0].mxu0 %v41_v49 }
 0x11d   :  { %v152_v60 = vpop.f32.mrb[0].mxu0 }
 0x11e   :  { %v153_v61 = vadd.f32 %v152_v60, %v79_v57  ;;  %v154_v62 = vpop.f32.mrb[1].mxu0 }
 0x11f   :  { %v155_v63 = vadd.f32 %v154_v62, %v83_v58 }
 0x121   :  { %v159_v1 = vcombine.low %v153_v61, %v155_v63 }
 0x123   :  { %v166_v2 = vrot.slane %v159_v1, %v165_v0 }
 0x125   :  { %v173_v3 = vrot.slane %v166_v2, %v165_v0 }
 0x127   :  { %179 = vst.msk [vmem:[#allocation7] sm:$0x3] %vm177_vm0, %v173_v3 }
 0x128   :  { %290 = shalt.err (!%p287_p6)
}
 0x129   :  { %s291_s16 = scalar_lea.hbm %s383_s3, 32 }
 0x12a   :  { %p292_p7 = scmp.ne.s32.totalorder %s383_s3, %s291_s16  ;;  %p295_p8 = scmp.lt.u32.totalorder %s291_s16, %s383_s3 }
 0x12c   :  { %p297_p9 = pnand %p295_p8, %p292_p7 }
 0x12e   :  { %300 = shalt.err (!%p297_p9)
}
 0x12f   :  { %189 = dma.vmem_to_hbm [thread:$0]  %s187_s13, 32, %s383_s3, [#allocation4]  }
 0x130   :  { %305 = dma.done.wait [#allocation4], 32  }
 0x131   :  { %306 = vsyncadd [#allocation4], 4294967264 }
 0x132   :  { %193 = vsyncpa [#allocation3], 1 }
 0x133   :  { %194 = vsyncpa [#allocation6], 1 }
 0x134   :  { %195 = vsyncpa [#allocation4], 1 }

</bundles_post_ra>
